<compile_context>
chip_gen: v7x
topology: tpu7x:2x2x1
jax: 0.10.0
libtpu: 0.0.40
codegen_flags: <defaults>
</compile_context>

<pallas_src>
import functools

import jax
import jax.numpy as jnp
from jax.experimental import pallas as pl
from jax.experimental.pallas import tpu as pltpu


def _round_up(x, m):
    return ((x + m - 1) // m) * m


def _encoder_image_kernel(x_ref, wcat_ref, bcat_ref, w2_ref, b2_ref, o_ref,
                          *, embed_size, compute_dtype, no_imgnorm):
    """One (tm, img_dim) row tile -> (tm, embed_size) (l2-normalized) features."""
    # In-kernel bf16 cast (x stays f32 in HBM -> no extra wrapper HBM pass).
    x = x_ref[...].astype(compute_dtype)

    # Fused first stage: both K=img_dim matmuls share the same LHS tile, so
    # one MXU pass computes [fc_preact | mlp_hidden_preact].
    y = jnp.dot(x, wcat_ref[...], preferred_element_type=jnp.float32)
    y = y + bcat_ref[...]                                 # f32 bias add

    fc = y[:, :embed_size]                                # fc branch (bias incl.)
    h = jnp.maximum(y[:, embed_size:], 0.0)               # ReLU (BN folded in)

    # Second stage: hidden -> embed (bf16 MXU, f32 accumulate).
    mlp = jnp.dot(h.astype(w2_ref.dtype), w2_ref[...],
                  preferred_element_type=jnp.float32)
    feat = fc + mlp + b2_ref[...]

    if not no_imgnorm:
        # l2norm over the last dim: x / (sqrt(sum(x^2, -1)) + 1e-8).
        # Cross-lane sum -> XLU, sqrt/reciprocal -> EUP (off the VALU path).
        ssum = jnp.sum(feat * feat, axis=-1, keepdims=True)
        inv = pl.reciprocal(jnp.sqrt(ssum) + 1e-8, approx=True)
        feat = feat * inv

    o_ref[...] = feat.astype(o_ref.dtype)


def encoder_image_forward(images, params, *, tm=512,
                          compute_dtype=jnp.bfloat16,
                          out_dtype=jnp.float32,      # set bf16 if downstream allows
                          no_imgnorm=False):
    """images: (B, N, img_dim) float32 -> (B, N, embed_size) out_dtype."""
    B, N, img_dim = images.shape
    wfc, bfc, w1, b1, w2, b2 = params
    embed_size = wfc.shape[1]
    hidden = w1.shape[1]

    # --- glue: fuse the shared-LHS weights, cast weights to bf16 ------------
    w_cat = jnp.concatenate([wfc, w1], axis=1).astype(compute_dtype)   # (D, E+H)
    b_cat = jnp.concatenate([bfc, b1], axis=1).astype(jnp.float32)     # (1, E+H)
    w2c = w2.astype(compute_dtype)                                     # (H, E)
    b2c = b2.astype(jnp.float32)                                       # (1, E)

    M = B * N
    # No pad / no cast here: the reshape of a contiguous array is free and the
    # bf16 cast happens inside the kernel.
    x2d = images.reshape(M, img_dim)

    # Large MXU-friendly row tile, clamped for small inputs; the ragged final
    # block is handled by Pallas (OOB input rows are garbage but row-local,
    # OOB output writes are masked/dropped).
    tm_eff = min(tm, _round_up(M, 8))
    grid = (pl.cdiv(M, tm_eff),)

    w_itemsize = jnp.dtype(compute_dtype).itemsize
    out_itemsize = jnp.dtype(out_dtype).itemsize

    # Cost hint for XLA scheduling around the custom call.
    flops = 2 * M * (img_dim * (embed_size + hidden) + hidden * embed_size)
    weight_bytes = ((w_cat.size + w2c.size) * w_itemsize
                    + (b_cat.size + b2c.size) * 4)
    bytes_accessed = (M * img_dim * images.dtype.itemsize
                      + M * embed_size * out_itemsize
                      + weight_bytes)
    cost = pl.CostEstimate(flops=int(flops), transcendentals=2 * M,
                           bytes_accessed=int(bytes_accessed))

    # --- VMEM accounting -----------------------------------------------------
    # Weights/biases are single-buffered (constant index_map, pl.Buffered(1));
    # the input/output tiles are double-buffered; the in-kernel temporaries
    # (y f32, feat f32, h bf16, x bf16 cast) are counted explicitly.
    x_tile_bytes = 2 * tm_eff * img_dim * images.dtype.itemsize
    out_tile_bytes = 2 * tm_eff * embed_size * out_itemsize
    tmp_bytes = (tm_eff * (embed_size + hidden) * 4      # y (f32)
                 + tm_eff * embed_size * 4               # feat (f32)
                 + tm_eff * hidden * w_itemsize          # h (bf16)
                 + tm_eff * img_dim * w_itemsize)        # x bf16 cast
    vmem_est = weight_bytes + x_tile_bytes + out_tile_bytes + tmp_bytes

    # Always set the scoped limit explicitly (v5e default is only 16 MiB) and
    # clamp it to 7/8 of the physical per-core VMEM (64 MiB/TC on v7x,
    # 128 MiB on v5e/v6e) so the request is always realizable.
    try:
        info = pltpu.get_tpu_info()
        phys_vmem = int(getattr(info, "vmem_capacity_bytes", 64 * 1024 * 1024))
    except Exception:  # conservative fallback: v7x per-TC VMEM
        phys_vmem = 64 * 1024 * 1024
    vmem_cap = (phys_vmem * 7) // 8
    vmem_limit = int(min(max(2 * vmem_est, 32 * 1024 * 1024), vmem_cap))

    # Constant (resident) operands: single-buffered.
    const_spec = functools.partial(
        pl.BlockSpec,
        index_map=lambda i: (0, 0),
        pipeline_mode=pl.Buffered(buffer_count=1))

    out = pl.pallas_call(
        functools.partial(_encoder_image_kernel,
                          embed_size=embed_size,
                          compute_dtype=compute_dtype,
                          no_imgnorm=no_imgnorm),
        out_shape=jax.ShapeDtypeStruct((M, embed_size), out_dtype),
        grid_spec=pltpu.PrefetchScalarGridSpec(
            num_scalar_prefetch=0,
            grid=grid,
            in_specs=[
                pl.BlockSpec((tm_eff, img_dim), lambda i: (i, 0)),   # x tile (f32)
                const_spec((img_dim, embed_size + hidden)),          # [W_fc | W1]
                const_spec((1, embed_size + hidden)),                # [b_fc | b1]
                const_spec((hidden, embed_size)),                    # W2
                const_spec((1, embed_size)),                         # b2
            ],
            out_specs=pl.BlockSpec((tm_eff, embed_size), lambda i: (i, 0)),
        ),
        compiler_params=pltpu.CompilerParams(
            dimension_semantics=("parallel",),     # row tiles split across TCs
            vmem_limit_bytes=vmem_limit),
        cost_estimate=cost,
    )(x2d, w_cat, b_cat, w2c, b2c)

    return out.reshape(B, N, embed_size)


def init_params(key, img_dim, embed_size):
    """Deterministic synthetic parameters mirroring EncoderImage.__init__."""
    hidden = embed_size // 2
    ks = jax.random.split(key, 8)

    # fc: Xavier-uniform, zero bias (as in init_weights()).
    r = jnp.sqrt(6.0) / jnp.sqrt(img_dim + embed_size)
    wfc = jax.random.uniform(ks[0], (img_dim, embed_size),
                             minval=-r, maxval=r, dtype=jnp.float32)
    bfc = jnp.zeros((1, embed_size), jnp.float32)

    # MLP layer 1: Linear(img_dim, hidden) followed by BatchNorm1d(hidden) (eval).
    lim1 = 1.0 / jnp.sqrt(jnp.float32(img_dim))
    w1 = jax.random.uniform(ks[1], (img_dim, hidden),
                            minval=-lim1, maxval=lim1, dtype=jnp.float32)
    b1 = jax.random.uniform(ks[2], (hidden,),
                            minval=-lim1, maxval=lim1, dtype=jnp.float32)
    # Deterministic BN stats / affine params (eval mode), folded into layer 1.
    gamma = 1.0 + 0.01 * jnp.arange(hidden, dtype=jnp.float32)
    beta = 0.02 * jnp.arange(hidden, dtype=jnp.float32)
    running_mean = 0.1 * jnp.ones((hidden,), jnp.float32)
    running_var = jnp.ones((hidden,), jnp.float32)
    bn_eps = 1e-5
    scale = gamma / jnp.sqrt(running_var + bn_eps)
    w1_folded = w1 * scale[None, :]
    b1_folded = ((b1 - running_mean) * scale + beta)[None, :]

    # MLP layer 2: Linear(hidden, embed_size).
    lim2 = 1.0 / jnp.sqrt(jnp.float32(hidden))
    w2 = jax.random.uniform(ks[3], (hidden, embed_size),
                            minval=-lim2, maxval=lim2, dtype=jnp.float32)
    b2 = jax.random.uniform(ks[4], (1, embed_size),
                            minval=-lim2, maxval=lim2, dtype=jnp.float32)

    return (wfc, bfc, w1_folded, b1_folded, w2, b2)


def reference_forward(images, params, compute_dtype=jnp.bfloat16):
    """Pure-JAX reference mirroring the kernel's bf16-input / f32-accumulate path."""
    wfc, bfc, w1, b1, w2, b2 = params
    f32 = jnp.float32
    x = images.astype(compute_dtype).astype(f32)
    fc = x @ wfc.astype(compute_dtype).astype(f32) + bfc[0]
    h = jnp.maximum(x @ w1.astype(compute_dtype).astype(f32) + b1[0], 0.0)
    h = h.astype(compute_dtype).astype(f32)
    mlp = h @ w2.astype(compute_dtype).astype(f32) + b2[0]
    feat = fc + mlp
    norm = jnp.sqrt(jnp.sum(feat * feat, axis=-1, keepdims=True)) + 1e-8
    return feat / norm


if __name__ == "__main__":
    B, N = 2, 37          # batch, number of regions (odd N exercises ragged tiling)
    img_dim = 64          # input feature dim
    embed_size = 256      # hidden = 128: both lane-aligned -> zero-cost slices

    key = jax.random.PRNGKey(0)
    k_params, k_x = jax.random.split(key)
    params = init_params(k_params, img_dim, embed_size)
    images = jax.random.normal(k_x, (B, N, img_dim), dtype=jnp.float32)

    out = encoder_image_forward(images, params)
    out = jax.block_until_ready(out)

    ref = reference_forward(images, params)
    assert out.shape == (B, N, embed_size)
    # bf16 matmuls + approximate EUP reciprocal -> loosened tolerance vs. f32 ref.
    assert jnp.allclose(out, ref, atol=2e-2, rtol=2e-2), (
        "mismatch vs reference, max abs err = "
        f"{float(jnp.max(jnp.abs(out - ref)))}")

    print("KERNEL_OK")
</pallas_src>

<mosaic_0001>
module attributes {stable_mosaic.version = 11 : i64} {
  func.func @_encoder_image_kernel(%arg0: i32, %arg1: memref<80x64xf32, #tpu.memory_space<vmem>>, %arg2: memref<64x384xbf16, #tpu.memory_space<vmem>>, %arg3: memref<1x384xf32, #tpu.memory_space<vmem>>, %arg4: memref<128x256xbf16, #tpu.memory_space<vmem>>, %arg5: memref<1x256xf32, #tpu.memory_space<vmem>>, %arg6: memref<80x256xf32, #tpu.memory_space<vmem>>) attributes {dimension_semantics = [#tpu.dimension_semantics<parallel>], iteration_bounds = array<i64: 1>, scalar_prefetch = 0 : i64, scratch_operands = 0 : i64, tpu.core_type = #tpu.core_type<tc>, window_params = [{transform_indices = @transform_0, window_bounds = array<i64: 80, 64>}, {pipeline_mode = #tpu.pipeline_mode<synchronous>, transform_indices = @transform_1, window_bounds = array<i64: 64, 384>}, {pipeline_mode = #tpu.pipeline_mode<synchronous>, transform_indices = @transform_2, window_bounds = array<i64: 1, 384>}, {pipeline_mode = #tpu.pipeline_mode<synchronous>, transform_indices = @transform_3, window_bounds = array<i64: 128, 256>}, {pipeline_mode = #tpu.pipeline_mode<synchronous>, transform_indices = @transform_4, window_bounds = array<i64: 1, 256>}, {transform_indices = @transform_5, window_bounds = array<i64: 80, 256>}]} {
    %c0 = arith.constant 0 : index
    %c0_0 = arith.constant 0 : index
    %0 = vector.load %arg1[%c0, %c0_0] : memref<80x64xf32, #tpu.memory_space<vmem>>, vector<80x64xf32>
    %1 = arith.truncf %0 : vector<80x64xf32> to vector<80x64xbf16>
    %c0_1 = arith.constant 0 : index
    %c0_2 = arith.constant 0 : index
    %2 = vector.load %arg2[%c0_1, %c0_2] : memref<64x384xbf16, #tpu.memory_space<vmem>>, vector<64x384xbf16>
    %cst = arith.constant dense<0.000000e+00> : vector<80x384xf32>
    %3 = tpu.matmul %1, %2, %cst {dimension_numbers = #tpu.dot_dimension_numbers<[1], [0], [0], [1], [0, 0, 1, 1], [], []>} : vector<80x64xbf16>, vector<64x384xbf16>, vector<80x384xf32> -> vector<80x384xf32>
    %c0_3 = arith.constant 0 : index
    %c0_4 = arith.constant 0 : index
    %4 = vector.load %arg3[%c0_3, %c0_4] : memref<1x384xf32, #tpu.memory_space<vmem>>, vector<1x384xf32>
    %5 = vector.broadcast %4 : vector<1x384xf32> to vector<80x384xf32>
    %6 = arith.addf %3, %5 : vector<80x384xf32>
    %7 = vector.extract_strided_slice %6 {offsets = [0, 0], sizes = [80, 256], strides = [1, 1]} : vector<80x384xf32> to vector<80x256xf32>
    %8 = vector.extract_strided_slice %6 {offsets = [0, 256], sizes = [80, 128], strides = [1, 1]} : vector<80x384xf32> to vector<80x128xf32>
    %cst_5 = arith.constant 0.000000e+00 : f32
    %9 = vector.broadcast %cst_5 : f32 to vector<80x128xf32>
    %10 = arith.maximumf %8, %9 : vector<80x128xf32>
    %11 = arith.truncf %10 : vector<80x128xf32> to vector<80x128xbf16>
    %c0_6 = arith.constant 0 : index
    %c0_7 = arith.constant 0 : index
    %12 = vector.load %arg4[%c0_6, %c0_7] : memref<128x256xbf16, #tpu.memory_space<vmem>>, vector<128x256xbf16>
    %cst_8 = arith.constant dense<0.000000e+00> : vector<80x256xf32>
    %13 = tpu.matmul %11, %12, %cst_8 {dimension_numbers = #tpu.dot_dimension_numbers<[1], [0], [0], [1], [0, 0, 1, 1], [], []>} : vector<80x128xbf16>, vector<128x256xbf16>, vector<80x256xf32> -> vector<80x256xf32>
    %14 = arith.addf %7, %13 : vector<80x256xf32>
    %c0_9 = arith.constant 0 : index
    %c0_10 = arith.constant 0 : index
    %15 = vector.load %arg5[%c0_9, %c0_10] : memref<1x256xf32, #tpu.memory_space<vmem>>, vector<1x256xf32>
    %16 = vector.broadcast %15 : vector<1x256xf32> to vector<80x256xf32>
    %17 = arith.addf %14, %16 : vector<80x256xf32>
    %18 = arith.mulf %17, %17 : vector<80x256xf32>
    %cst_11 = arith.constant dense<0.000000e+00> : vector<80xf32>
    %19 = vector.multi_reduction <add>, %18, %cst_11 [1] : vector<80x256xf32> to vector<80xf32>
    %20 = vector.shape_cast %19 : vector<80xf32> to vector<80x1xf32>
    %21 = math.sqrt %20 : vector<80x1xf32>
    %cst_12 = arith.constant 9.99999993E-9 : f32
    %22 = vector.broadcast %cst_12 : f32 to vector<80x1xf32>
    %23 = arith.addf %21, %22 : vector<80x1xf32>
    %24 = tpu.reciprocal %23 {approx = true} : vector<80x1xf32> -> vector<80x1xf32>
    %25 = vector.broadcast %24 : vector<80x1xf32> to vector<80x256xf32>
    %26 = arith.mulf %17, %25 : vector<80x256xf32>
    %c0_13 = arith.constant 0 : index
    %c0_14 = arith.constant 0 : index
    %27 = vector.load %arg6[%c0_13, %c0_14] : memref<80x256xf32, #tpu.memory_space<vmem>>, vector<80x256xf32>
    tpu.vector_store %arg6[%c0_13, %c0_14], %26 {strides = array<i32>} : memref<80x256xf32, #tpu.memory_space<vmem>>, vector<80x256xf32>,
    return
  }
  func.func @transform_0(%arg0: i32) -> (i32, i32) {
    %c0_i32 = arith.constant 0 : i32
    %c0_i32_0 = arith.constant 0 : i32
    return %arg0, %c0_i32 : i32, i32
  }
  func.func @transform_1(%arg0: i32) -> (i32, i32) {
    %c0_i32 = arith.constant 0 : i32
    %c0_i32_0 = arith.constant 0 : i32
    %c0_i32_1 = arith.constant 0 : i32
    return %c0_i32, %c0_i32_0 : i32, i32
  }
  func.func @transform_2(%arg0: i32) -> (i32, i32) {
    %c0_i32 = arith.constant 0 : i32
    %c0_i32_0 = arith.constant 0 : i32
    %c0_i32_1 = arith.constant 0 : i32
    return %c0_i32, %c0_i32_0 : i32, i32
  }
  func.func @transform_3(%arg0: i32) -> (i32, i32) {
    %c0_i32 = arith.constant 0 : i32
    %c0_i32_0 = arith.constant 0 : i32
    %c0_i32_1 = arith.constant 0 : i32
    return %c0_i32, %c0_i32_0 : i32, i32
  }
  func.func @transform_4(%arg0: i32) -> (i32, i32) {
    %c0_i32 = arith.constant 0 : i32
    %c0_i32_0 = arith.constant 0 : i32
    %c0_i32_1 = arith.constant 0 : i32
    return %c0_i32, %c0_i32_0 : i32, i32
  }
  func.func @transform_5(%arg0: i32) -> (i32, i32) {
    %c0_i32 = arith.constant 0 : i32
    %c0_i32_0 = arith.constant 0 : i32
    return %arg0, %c0_i32 : i32, i32
  }
}

</mosaic_0001>

<bundles_post_ra>
// kernel: tpu_custom_call.1
= control target key start
LH: loop header
LB: loop body
LE: loop exit
PB: predicated region body
PF: predicated region fallthrough
CT: control target
= control target key end

     0   :  { %10 = vsyncpa [#allocation3], 0  ;;  %s1394_s0 = inlined_call_operand.vmem [shape: f32[74,64], index: 0, kind: input, shape index: {}]   ;;  %s1395_s1 = inlined_call_operand.hbm [shape: bf16[64,384], index: 1, kind: input, shape index: {}]   ;;  %s1396_s2 = inlined_call_operand.vmem [shape: f32[1,384], index: 2, kind: input, shape index: {}]   ;;  %s1397_s3 = inlined_call_operand.vmem [shape: bf16[128,256], index: 3, kind: input, shape index: {}]   ;;  %s1398_s4 = inlined_call_operand.vmem [shape: f32[1,256], index: 4, kind: input, shape index: {}]   ;;  %s1399_s5 = inlined_call_operand.hbm [shape: f32[74,256], index: 5, kind: output, shape index: {}]  }
   0x1   :  { %11 = vsyncpa [#allocation4], 0  ;;  %s1031_s18 = smov [#allocation2]   ;;  %s983_s22 = scalar_lea.hbm %s1395_s1, 1536 }
   0x2   :  { %s19_s19 = sshll.u32 %s1031_s18, 4  ;;  %p984_p0 = scmp.ne.s32.totalorder %s1395_s1, %s983_s22  ;;  %s20_s19 = int_to_ptr.vmem [resolvable:$true] %s19_s19 }
   0x3   :  { %p987_p1 = scmp.lt.u32.totalorder %s983_s22, %s1395_s1 }
   0x5   :  { %p989_p2 = pnand %p987_p1, %p984_p0 }
   0x7   :  { %992 = shalt.err (!%p989_p2)
}
   0x8   :  { %s993_s27 = scalar_lea.vmem %s20_s19, 1536  ;;  %p998_p4 = scmp.lt.s32.totalorder %s20_s19, %s20_s19 }
   0x9   :  { %p994_p3 = scmp.ne.s32.totalorder %s20_s19, %s993_s27  ;;  %p999_p5 = scmp.lt.s32.totalorder %s993_s27, %s993_s27 }
   0xb   :  { %p1000_p6 = por %p999_p5, %p998_p4 }
   0xd   :  { %p1001_p7 = pnand %p1000_p6, %p994_p3 }
   0xf   :  { %1004 = shalt.err (!%p1001_p7)
}
  0x10   :  { %s1032_s28 = smov 192   ;;  %s1033_s29 = smov 12  }
  0x11   :  { %25 = dma.hbm_to_vmem [thread:$0]  %s1395_s1, 1536, %s20_s19, [#allocation3], %s1032_s28, %s1032_s28, %s1033_s29  }
  0x12   :  { %1027 = dma.done.wait [#allocation3], 1536  }
  0x13   :  { %1028 = vsyncadd [#allocation3], 4294965760  ;;  %v1034_v0 = vmov 0.0   ;;  %vm1035_vm0 = vmmov 0   ;;  %v1036_v1 = vmov 0   ;;  %v36_v8 = vld [vmem:[%s1394_s0] sm:$0xff]  ;;  %v69_v45 = vlaneseq }
  0x14   :  { %810 = vmatprep.subr.bf16.mxu1 %v1034_v0  ;;  %818 = vmatprep.mubr.msk.bf16.mxu1 %vm1035_vm0, %v1034_v0  ;;  %v903_v2 = vld [vmem:[#allocation2 + $0x8] ss:$12 sps:$4 sm:$0xff]   ;;  %v904_v3 = vld [vmem:[#allocation2 + $0x20] ss:$12 sps:$4 sm:$0xff]   ;;  %v905_v4 = vld [vmem:[#allocation2 + $0x38] ss:$12 sps:$4 sm:$0xff]  }
  0x15   :  { %196 = vmatprep.mubr.bf16.mxu0 %v1036_v1  ;;  %811 = vmatpush3.bf16.msra.mxu1 %v903_v2  ;;  %v906_v5 = vld [vmem:[#allocation2 + $0x50] ss:$12 sps:$4 sm:$0xff]   ;;  %v909_v7 = vld [vmem:[#allocation2] ss:$12 sps:$4 sm:$0xff]   ;;  %v912_v11 = vld [vmem:[#allocation2 + $0x18] ss:$12 sps:$4 sm:$0xff]  }
  0x16   :  { %812 = vmatprep.subr.bf16.mxu1 %v1034_v0  ;;  %v907_v6 = vld [vmem:[#allocation2 + $0x4] ss:$12 sps:$4 sm:$0xff]   ;;  %v910_v9 = vld [vmem:[#allocation2 + $0x1c] ss:$12 sps:$4 sm:$0xff]   ;;  %v913_v12 = vld [vmem:[#allocation2 + $0x34] ss:$12 sps:$4 sm:$0xff]  }
  0x17   :  { %v37_v10 = vld [vmem:[%s1394_s0 + $0x8] sm:$0xff]  ;;  %164 = vmatprep.subr.bf16.mxu0 %v907_v6  ;;  %vm148_vm1 = vcmask 523264   ;;  %v915_v15 = vld [vmem:[#allocation2 + $0x30] ss:$12 sps:$4 sm:$0xff]   ;;  %v40_v25 = vld [vmem:[%s1394_s0 + $0x20] sm:$0xff]  ;;  %v1191_v46 = vshrl.u32 %v69_v45, 7 }
  0x18   :  { %165 = vmatpush1.bf16.msra.mxu0 %v909_v7  ;;  %v46_v13 = vpack.c.bf16 %v37_v10, %v36_v8  ;;  %v921_v14 = vld [vmem:[%s1397_s3 + $0x4] ss:$8 sps:$4 sm:$0xff]   ;;  %v919_v17 = vld [vmem:[%s1397_s3] ss:$8 sps:$4 sm:$0xff]   ;;  %v38_v18 = vld [vmem:[%s1394_s0 + $0x10] sm:$0xff] }
  0x19   :  { %813 = vmatpush3.bf16.msra.mxu1 %v904_v3  ;;  %166 = vmatprep.subr.bf16.mxu0 %v910_v9  ;;  %v916_v16 = vld [vmem:[#allocation2 + $0x4c] ss:$12 sps:$4 sm:$0xff]   ;;  %v924_v19 = vld [vmem:[%s1397_s3 + $0x14] ss:$8 sps:$4 sm:$0xff]   ;;  %v925_v27 = vld [vmem:[%s1397_s3 + $0x20] ss:$8 sps:$4 sm:$0xff]  }
  0x1a   :  { %814 = vmatprep.subr.bf16.mxu1 %v1034_v0  ;;  %v39_v20 = vld [vmem:[%s1394_s0 + $0x18] sm:$0xff]  ;;  %v918_v21 = vld [vmem:[#allocation2 + $0x48] ss:$12 sps:$4 sm:$0xff]   ;;  %v927_v23 = vld [vmem:[%s1397_s3 + $0x24] ss:$8 sps:$4 sm:$0xff]   ;;  %v79_v47 = vsub.s32 2, %v1191_v46 }
  0x1b   :  { %v922_v22 = vld [vmem:[%s1397_s3 + $0x10] ss:$8 sps:$4 sm:$0xff]   ;;  %v47_v24 = vpack.c.bf16 %v39_v20, %v38_v18  ;;  %v41_v26 = vld [vmem:[%s1394_s0 + $0x28] sm:$0xff]  ;;  %v930_v28 = vld [vmem:[%s1397_s3 + $0x34] ss:$8 sps:$4 sm:$0xff]  }
  0x1c   :  { %167 = vmatpush1.bf16.msra.mxu0 %v912_v11  ;;  %v48_v29 = vpack.c.bf16 %v41_v26, %v40_v25  ;;  %v928_v30 = vld [vmem:[%s1397_s3 + $0x30] ss:$8 sps:$4 sm:$0xff]   ;;  %v933_v31 = vld [vmem:[%s1397_s3 + $0x44] ss:$8 sps:$4 sm:$0xff]   ;;  %v931_v34 = vld [vmem:[%s1397_s3 + $0x40] ss:$8 sps:$4 sm:$0xff]  }
  0x1d   :  { %815 = vmatpush3.bf16.msra.mxu1 %v905_v4  ;;  %168 = vmatprep.subr.bf16.mxu0 %v913_v12  ;;  %v42_v32 = vld [vmem:[%s1394_s0 + $0x30] sm:$0xff]  ;;  %v43_v33 = vld [vmem:[%s1394_s0 + $0x38] sm:$0xff]  ;;  %v44_v38 = vld [vmem:[%s1394_s0 + $0x40] sm:$0xff] }
  0x1e   :  { %816 = vmatprep.subr.bf16.mxu1 %v1034_v0  ;;  %v936_v35 = vld [vmem:[%s1397_s3 + $0x54] ss:$8 sps:$4 sm:$0xff]   ;;  %v49_v36 = vpack.c.bf16 %v43_v33, %v42_v32  ;;  %v934_v37 = vld [vmem:[%s1397_s3 + $0x50] ss:$8 sps:$4 sm:$0xff]   ;;  %v45_v39 = vld [vmem:[%s1394_s0 + $0x48] sm:$0xff] }
  0x1f   :  { %v50_v40 = vpack.c.bf16 %v45_v39, %v44_v38  ;;  %v939_v41 = vld [vmem:[%s1397_s3 + $0x64] ss:$8 sps:$4 sm:$0xff]   ;;  %v937_v42 = vld [vmem:[%s1397_s3 + $0x60] ss:$8 sps:$4 sm:$0xff]   ;;  %v942_v43 = vld [vmem:[%s1397_s3 + $0x74] ss:$8 sps:$4 sm:$0xff]  }
  0x20   :  { %169 = vmatpush1.bf16.msra.mxu0 %v915_v15  ;;  %v940_v44 = vld [vmem:[%s1397_s3 + $0x70] ss:$8 sps:$4 sm:$0xff]   ;;  %v1197_v48 = vld [vmem:[%s1396_s2] sm:$0x7] }
  0x21   :  { %817 = vmatpush3.bf16.msra.mxu1 %v906_v5  ;;  %170 = vmatprep.subr.bf16.mxu0 %v916_v16  ;;  %v80_v49 = vrot.slane %v1197_v48, %v79_v47 }
  0x22   :  { %838 = vmatprep.subr.bf16.mxu1 %v921_v14 }
  0x24   :  { %819 = vmatmul.mubr.msk.bf16.vlgmr.msra.gmra.mrb[0].mxu1 %vm148_vm1, %v46_v13  ;;  %171 = vmatpush1.bf16.msra.mxu0 %v918_v21 }
  0x25   :  { %822 = vmatprep.mubr.msk.bf16.mxu1 %vm1035_vm0, %v1034_v0  ;;  %846 = vmatpush1.bf16.msra.mxu1 %v919_v17 }
  0x26   :  { %839 = vmatprep.subr.bf16.mxu1 %v924_v19  ;;  %431 = vmatprep.subr.bf16.mxu0 %v921_v14 }
  0x27   :  { %775 = vmatmul.mubr.msk.bf16.vlgmr.msra.gmra.mrb[0].mxu0 %vm148_vm1, %v46_v13 }
  0x28   :  { %206 = vmatprep.mubr.bf16.mxu0 %v1036_v1  ;;  %432 = vmatpush1.bf16.msra.mxu0 %v919_v17 }
  0x29   :  { %847 = vmatpush1.bf16.msra.mxu1 %v922_v22  ;;  %433 = vmatprep.subr.bf16.mxu0 %v924_v19 }
  0x2a   :  { %840 = vmatprep.subr.bf16.mxu1 %v927_v23 }
  0x2c   :  { %823 = vmatmul.mubr.msk.bf16.gmra.mrb[4].mxu1 %vm148_vm1, %v47_v24  ;;  %434 = vmatpush1.bf16.msra.mxu0 %v922_v22 }
  0x2d   :  { %826 = vmatprep.mubr.msk.bf16.mxu1 %vm1035_vm0, %v1034_v0  ;;  %848 = vmatpush1.bf16.msra.mxu1 %v925_v27 }
  0x2e   :  { %841 = vmatprep.subr.bf16.mxu1 %v930_v28  ;;  %435 = vmatprep.subr.bf16.mxu0 %v927_v23 }
  0x2f   :  { %776 = vmatmul.mubr.msk.bf16.gmra.mrb[4].mxu0 %vm148_vm1, %v47_v24 }
  0x30   :  { %216 = vmatprep.mubr.bf16.mxu0 %v1036_v1  ;;  %436 = vmatpush1.bf16.msra.mxu0 %v925_v27 }
  0x31   :  { %849 = vmatpush1.bf16.msra.mxu1 %v928_v30  ;;  %437 = vmatprep.subr.bf16.mxu0 %v930_v28 }
  0x32   :  { %842 = vmatprep.subr.bf16.mxu1 %v933_v31 }
  0x34   :  { %827 = vmatmul.mubr.msk.bf16.gmra.mrb[8].mxu1 %vm148_vm1, %v48_v29  ;;  %438 = vmatpush1.bf16.msra.mxu0 %v928_v30 }
  0x35   :  { %830 = vmatprep.mubr.msk.bf16.mxu1 %vm1035_vm0, %v1034_v0  ;;  %850 = vmatpush1.bf16.msra.mxu1 %v931_v34 }
  0x36   :  { %843 = vmatprep.subr.bf16.mxu1 %v936_v35  ;;  %439 = vmatprep.subr.bf16.mxu0 %v933_v31 }
  0x37   :  { %777 = vmatmul.mubr.msk.bf16.gmra.mrb[8].mxu0 %vm148_vm1, %v48_v29 }
  0x38   :  { %226 = vmatprep.mubr.bf16.mxu0 %v1036_v1  ;;  %440 = vmatpush1.bf16.msra.mxu0 %v931_v34 }
  0x39   :  { %851 = vmatpush1.bf16.msra.mxu1 %v934_v37  ;;  %441 = vmatprep.subr.bf16.mxu0 %v936_v35 }
  0x3a   :  { %844 = vmatprep.subr.bf16.mxu1 %v939_v41 }
  0x3c   :  { %831 = vmatmul.mubr.msk.bf16.gmra.mrb[12].mxu1 %vm148_vm1, %v49_v36  ;;  %442 = vmatpush1.bf16.msra.mxu0 %v934_v37 }
  0x3d   :  { %834 = vmatprep.mubr.msk.bf16.mxu1 %vm1035_vm0, %v1034_v0  ;;  %443 = vmatprep.subr.bf16.mxu0 %v939_v41  ;;  %v534_v41 = vld [vmem:[%s1398_s4] sm:$0x3]  ;;  %s1037_s4 = smov [#allocation5]  }
  0x3e   :  { %852 = vmatpush1.bf16.msra.mxu1 %v937_v42  ;;  %s751_s7 = sshll.u32 %s1037_s4, 4  ;;  %s752_s7 = int_to_ptr.vmem [resolvable:$true] %s751_s7 }
  0x3f   :  { %778 = vmatmul.mubr.msk.bf16.gmra.mrb[12].mxu0 %vm148_vm1, %v49_v36  ;;  %845 = vmatprep.subr.bf16.mxu1 %v942_v43  ;;  %s1005_s8 = scalar_lea.vmem %s752_s7, 2560  ;;  %p1010_p9 = scmp.lt.s32.totalorder %s752_s7, %s752_s7 }
  0x40   :  { %236 = vmatprep.mubr.bf16.mxu0 %v1036_v1  ;;  %444 = vmatpush1.bf16.msra.mxu0 %v937_v42  ;;  %p1006_p8 = scmp.ne.s32.totalorder %s752_s7, %s1005_s8  ;;  %p1011_p10 = scmp.lt.s32.totalorder %s1005_s8, %s1005_s8 }
  0x41   :  { %445 = vmatprep.subr.bf16.mxu0 %v942_v43 }
  0x42   :  { %853 = vmatpush1.bf16.msra.mxu1 %v940_v44  ;;  %p1012_p11 = por %p1011_p10, %p1010_p9 }
  0x44   :  { %835 = vmatmul.mubr.msk.bf16.gmra.mrb[16].mxu1 %vm148_vm1, %v50_v40  ;;  %446 = vmatpush1.bf16.msra.mxu0 %v940_v44  ;;  %p1013_p12 = pnand %p1012_p11, %p1006_p8 }
  0x45   :  { %493 = vmatprep.mubr.bf16.mxu1 %v1036_v1 }
  0x47   :  { %779 = vmatmul.mubr.msk.bf16.gmra.mrb[16].mxu0 %vm148_vm1, %v50_v40  ;;  %v75_v40 = vsub.s32 1, %v1191_v46 }
  0x48   :  { %463 = vmatprep.mubr.bf16.mxu0 %v1036_v1 }
  0x49   :  { %v1230_v44 = vrot.slane %v1197_v48, %v75_v40  ;;  %v1232_v47 = vrot.slane %v534_v41, %v75_v40 }
  0xf7   :  { %v281_v50 = vpop.f32.mrb[0].mxu1 }
  0xf8   :  { %v282_v51 = vadd.f32 %v281_v50, %v80_v49  ;;  %v820_v52 = vpop.f32.mrb[1].mxu1 }
  0xf9   :  { %v284_v53 = vpop.f32.mrb[2].mxu1 }
  0xfa   :  { %v285_v54 = vadd.f32 %v284_v53, %v80_v49  ;;  %v821_v55 = vpop.f32.mrb[3].mxu1  ;;  %v320_v56 = vmax.f32 %v282_v51, 0.0 }
  0xfc   :  { %v321_v57 = vmax.f32 %v285_v54, 0.0 }
  0xfe   :  { %v330_v58 = vpack.c.bf16 %v321_v57, %v320_v56 }
  0xff   :  { %v289_v59 = vpop.f32.mrb[4].mxu1 }
 0x100   :  { %v290_v60 = vadd.f32 %v289_v59, %v80_v49  ;;  %v824_v61 = vpop.f32.mrb[5].mxu1  ;;  %464 = vmatmul.mubr.bf16.vlgmr.msra.gmra.mrb[0].mxu0 %v330_v58 }
 0x101   :  { %v292_v62 = vpop.f32.mrb[6].mxu1  ;;  %473 = vmatprep.mubr.bf16.mxu0 %v1036_v1 }
 0x102   :  { %v293_v63 = vadd.f32 %v292_v62, %v80_v49  ;;  %v825_v0 = vpop.f32.mrb[7].mxu1  ;;  %v322_v2 = vmax.f32 %v290_v60, 0.0 }
 0x104   :  { %v323_v3 = vmax.f32 %v293_v63, 0.0 }
 0x106   :  { %v331_v4 = vpack.c.bf16 %v323_v3, %v322_v2 }
 0x107   :  { %v297_v5 = vpop.f32.mrb[8].mxu1 }
 0x108   :  { %v298_v6 = vadd.f32 %v297_v5, %v80_v49  ;;  %v828_v7 = vpop.f32.mrb[9].mxu1  ;;  %474 = vmatmul.mubr.bf16.gmra.mrb[4].mxu0 %v331_v4 }
 0x109   :  { %v300_v8 = vpop.f32.mrb[10].mxu1  ;;  %483 = vmatprep.mubr.bf16.mxu0 %v1036_v1 }
 0x10a   :  { %v301_v9 = vadd.f32 %v300_v8, %v80_v49  ;;  %v829_v10 = vpop.f32.mrb[11].mxu1  ;;  %v324_v11 = vmax.f32 %v298_v6, 0.0 }
 0x10c   :  { %v325_v12 = vmax.f32 %v301_v9, 0.0 }
 0x10e   :  { %v332_v13 = vpack.c.bf16 %v325_v12, %v324_v11 }
 0x10f   :  { %v305_v14 = vpop.f32.mrb[12].mxu1 }
 0x110   :  { %v306_v15 = vadd.f32 %v305_v14, %v80_v49  ;;  %v832_v16 = vpop.f32.mrb[13].mxu1  ;;  %484 = vmatmul.mubr.bf16.gmra.mrb[8].mxu0 %v332_v13 }
 0x111   :  { %v308_v17 = vpop.f32.mrb[14].mxu1 }
 0x112   :  { %v309_v18 = vadd.f32 %v308_v17, %v80_v49  ;;  %v833_v19 = vpop.f32.mrb[15].mxu1  ;;  %v326_v20 = vmax.f32 %v306_v15, 0.0  ;;  %v1202_v26 = vpop.f32.mrb[12].mxu0 }
 0x113   :  { %v1205_v28 = vpop.f32.mrb[13].mxu0 }
 0x114   :  { %v327_v21 = vmax.f32 %v309_v18, 0.0  ;;  %v1207_v31 = vpop.f32.mrb[14].mxu0 }
 0x115   :  { %v1209_v32 = vpop.f32.mrb[15].mxu0 }
 0x116   :  { %v333_v22 = vpack.c.bf16 %v327_v21, %v326_v20 }
 0x117   :  { %v313_v23 = vpop.f32.mrb[16].mxu1 }
 0x118   :  { %v314_v24 = vadd.f32 %v313_v23, %v80_v49  ;;  %v836_v25 = vpop.f32.mrb[17].mxu1  ;;  %494 = vmatmul.mubr.bf16.vlgmr.msra.gmra.mrb[20].mxu1 %v333_v22 }
 0x119   :  { %v316_v27 = vpop.f32.mrb[18].mxu1  ;;  %503 = vmatprep.mubr.bf16.mxu1 %v1036_v1  ;;  %v71_v1 = vsub.s32 0, %v1191_v46 }
 0x11a   :  { %v317_v29 = vadd.f32 %v316_v27, %v80_v49  ;;  %v837_v30 = vpop.f32.mrb[19].mxu1  ;;  %v328_v33 = vmax.f32 %v314_v24, 0.0  ;;  %v1211_v36 = vpop.f32.mrb[16].mxu0 }
 0x11b   :  { %v1213_v37 = vpop.f32.mrb[17].mxu0  ;;  %v1225_v42 = vrot.slane %v1197_v48, %v71_v1  ;;  %v1227_v43 = vrot.slane %v534_v41, %v71_v1 }
 0x11c   :  { %v329_v34 = vmax.f32 %v317_v29, 0.0  ;;  %v1215_v38 = vpop.f32.mrb[18].mxu0 }
 0x11d   :  { %v1217_v39 = vpop.f32.mrb[19].mxu0  ;;  %v229_v40 = vadd.f32 %v1202_v26, %v1225_v42 }
 0x11e   :  { %v334_v35 = vpack.c.bf16 %v329_v34, %v328_v33 }
 0x120   :  { %504 = vmatmul.mubr.bf16.gmra.mrb[24].mxu1 %v334_v35 }
 0x1d3   :  { %v465_v45 = vpop.f32.mrb[0].mxu0 }
 0x1d4   :  { %v854_v49 = vadd.f32 %v465_v45, %v1225_v42  ;;  %v467_v50 = vpop.f32.mrb[1].mxu0  ;;  %v231_v45 = vadd.f32 %v1205_v28, %v1230_v44 }
 0x1d5   :  { %v855_v46 = vadd.f32 %v467_v50, %v1230_v44  ;;  %v469_v51 = vpop.f32.mrb[2].mxu0 }
 0x1d6   :  { %v1237_v52 = vadd.f32 %v854_v49, %v1227_v43  ;;  %v856_v53 = vadd.f32 %v469_v51, %v1225_v42  ;;  %v471_v54 = vpop.f32.mrb[3].mxu0  ;;  %v233_v51 = vadd.f32 %v1207_v31, %v1225_v42 }
 0x1d7   :  { %v1241_v55 = vadd.f32 %v855_v46, %v1232_v47  ;;  %v857_v48 = vadd.f32 %v471_v54, %v1230_v44 }
 0x1d8   :  { %v1245_v56 = vadd.f32 %v856_v53, %v1227_v43  ;;  %v566_v57 = vmul.f32 %v1237_v52, %v1237_v52 }
 0x1d9   :  { %v1250_v58 = vadd.f32 %v857_v48, %v1232_v47  ;;  %v567_v59 = vmul.f32 %v1241_v55, %v1241_v55  ;;  %v235_v48 = vadd.f32 %v1209_v32, %v1230_v44 }
 0x1da   :  { %v568_v62 = vmul.f32 %v1245_v56, %v1245_v56 }
 0x1db   :  { %v475_v60 = vpop.f32.mrb[4].mxu0  ;;  %v586_v61 = vadd.f32 %v567_v59, %v566_v57  ;;  %v569_v63 = vmul.f32 %v1250_v58, %v1250_v58 }
 0x1dc   :  { %v858_v0 = vadd.f32 %v475_v60, %v1225_v42  ;;  %v477_v2 = vpop.f32.mrb[5].mxu0 }
 0x1dd   :  { %v859_v3 = vadd.f32 %v477_v2, %v1230_v44  ;;  %587 = vadd.xlane.f32.xlu0 %v586_v61  ;;  %v479_v4 = vpop.f32.mrb[6].mxu0  ;;  %v589_v10 = vadd.f32 %v569_v63, %v568_v62 }
 0x1de   :  { %v1261_v5 = vadd.f32 %v858_v0, %v1227_v43  ;;  %v860_v6 = vadd.f32 %v479_v4, %v1225_v42  ;;  %v481_v7 = vpop.f32.mrb[7].mxu0 }
 0x1df   :  { %v1265_v8 = vadd.f32 %v859_v3, %v1232_v47  ;;  %v861_v9 = vadd.f32 %v481_v7, %v1230_v44  ;;  %v239_v3 = vadd.f32 %v1211_v36, %v1225_v42 }
 0x1e0   :  { %v1269_v11 = vadd.f32 %v860_v6, %v1227_v43  ;;  %v570_v12 = vmul.f32 %v1261_v5, %v1261_v5  ;;  %v241_v6 = vadd.f32 %v1213_v37, %v1230_v44 }
 0x1e1   :  { %v1274_v13 = vadd.f32 %v861_v9, %v1232_v47  ;;  %590 = vadd.xlane.f32.xlu0 %v589_v10  ;;  %v571_v14 = vmul.f32 %v1265_v8, %v1265_v8 }
 0x1e2   :  { %v572_v17 = vmul.f32 %v1269_v11, %v1269_v11 }
 0x1e3   :  { %v485_v15 = vpop.f32.mrb[8].mxu0  ;;  %v592_v16 = vadd.f32 %v571_v14, %v570_v12  ;;  %v573_v18 = vmul.f32 %v1274_v13, %v1274_v13  ;;  %v243_v12 = vadd.f32 %v1215_v38, %v1225_v42 }
 0x1e4   :  { %v862_v19 = vadd.f32 %v485_v15, %v1225_v42  ;;  %v487_v20 = vpop.f32.mrb[9].mxu0 }
 0x1e5   :  { %v863_v21 = vadd.f32 %v487_v20, %v1230_v44  ;;  %593 = vadd.xlane.f32.xlu1 %v592_v16  ;;  %v489_v22 = vpop.f32.mrb[10].mxu0  ;;  %v595_v30 = vadd.f32 %v573_v18, %v572_v17  ;;  %v245_v16 = vadd.f32 %v1217_v39, %v1230_v44 }
 0x1e6   :  { %v1285_v23 = vadd.f32 %v862_v19, %v1227_v43  ;;  %v864_v24 = vadd.f32 %v489_v22, %v1225_v42  ;;  %v491_v25 = vpop.f32.mrb[11].mxu0 }
 0x1e7   :  { %v1289_v27 = vadd.f32 %v863_v21, %v1232_v47  ;;  %v865_v29 = vadd.f32 %v491_v25, %v1230_v44 }
 0x1e8   :  { %v1293_v33 = vadd.f32 %v864_v24, %v1227_v43  ;;  %v574_v34 = vmul.f32 %v1285_v23, %v1285_v23 }
 0x1e9   :  { %v1298_v35 = vadd.f32 %v865_v29, %v1232_v47  ;;  %596 = vadd.xlane.f32.xlu1 %v595_v30  ;;  %v575_v1 = vmul.f32 %v1289_v27, %v1289_v27 }
 0x1ea   :  { %v576_v41 = vmul.f32 %v1293_v33, %v1293_v33 }
 0x1eb   :  { %v495_v49 = vpop.f32.mrb[20].mxu1  ;;  %v598_v50 = vadd.f32 %v575_v1, %v574_v34  ;;  %v577_v46 = vmul.f32 %v1298_v35, %v1298_v35 }
 0x1ec   :  { %v526_v53 = vadd.f32 %v495_v49, %v229_v40  ;;  %v497_v54 = vpop.f32.mrb[21].mxu1 }
 0x1ed   :  { %v527_v26 = vadd.f32 %v497_v54, %v231_v45  ;;  %v499_v57 = vpop.f32.mrb[22].mxu1  ;;  %599 = vadd.xlane.f32.xlu0 %v598_v50  ;;  %v601_v59 = vadd.f32 %v577_v46, %v576_v41 }
 0x1ee   :  { %v1315_v60 = vadd.f32 %v1227_v43, %v526_v53  ;;  %v528_v28 = vadd.f32 %v499_v57, %v233_v51  ;;  %v501_v61 = vpop.f32.mrb[23].mxu1 }
 0x1ef   :  { %v1318_v62 = vadd.f32 %v1232_v47, %v527_v26  ;;  %v529_v63 = vadd.f32 %v501_v61, %v235_v48  ;;  %602 = vadd.xlane.f32.xlu1 %v601_v59 }
 0x1f0   :  { %v1321_v31 = vadd.f32 %v1227_v43, %v528_v28  ;;  %v578_v32 = vmul.f32 %v1315_v60, %v1315_v60 }
 0x1f1   :  { %v1326_v0 = vadd.f32 %v1232_v47, %v529_v63  ;;  %v579_v2 = vmul.f32 %v1318_v62, %v1318_v62 }
 0x1f2   :  { %v580_v4 = vmul.f32 %v1321_v31, %v1321_v31 }
 0x1f3   :  { %v505_v7 = vpop.f32.mrb[24].mxu1  ;;  %v604_v9 = vadd.f32 %v579_v2, %v578_v32  ;;  %v581_v10 = vmul.f32 %v1326_v0, %v1326_v0 }
 0x1f4   :  { %v530_v14 = vadd.f32 %v505_v7, %v239_v3  ;;  %v507_v15 = vpop.f32.mrb[25].mxu1 }
 0x1f5   :  { %v531_v36 = vadd.f32 %v507_v15, %v241_v6  ;;  %v509_v17 = vpop.f32.mrb[26].mxu1  ;;  %605 = vadd.xlane.f32.xlu0 %v604_v9  ;;  %v607_v18 = vadd.f32 %v581_v10, %v580_v4 }
 0x1f6   :  { %v1343_v19 = vadd.f32 %v1227_v43, %v530_v14  ;;  %v532_v37 = vadd.f32 %v509_v17, %v243_v12  ;;  %v511_v20 = vpop.f32.mrb[27].mxu1 }
 0x1f7   :  { %v1346_v21 = vadd.f32 %v1232_v47, %v531_v36  ;;  %v533_v22 = vadd.f32 %v511_v20, %v245_v16  ;;  %608 = vadd.xlane.f32.xlu1 %v607_v18 }
 0x1f8   :  { %v1349_v38 = vadd.f32 %v1227_v43, %v532_v37  ;;  %v582_v39 = vmul.f32 %v1343_v19, %v1343_v19 }
 0x1f9   :  { %v1354_v42 = vadd.f32 %v1232_v47, %v533_v22  ;;  %v583_v44 = vmul.f32 %v1346_v21, %v1346_v21 }
 0x1fa   :  { %v584_v24 = vmul.f32 %v1349_v38, %v1349_v38 }
 0x1fb   :  { %v610_v25 = vadd.f32 %v583_v44, %v582_v39  ;;  %v585_v29 = vmul.f32 %v1354_v42, %v1354_v42 }
 0x1fd   :  { %611 = vadd.xlane.f32.xlu0 %v610_v25  ;;  %v613_v30 = vadd.f32 %v585_v29, %v584_v24 }
 0x1ff   :  { %614 = vadd.xlane.f32.xlu1 %v613_v30 }
 0x26a   :  { %v588_v43 = vpop.xlane.xlu0 %587 }
 0x26b   :  { %943 = vrsqrt.f32 %v588_v43  ;;  %vm618_vm2 = vcmp.eq.f32.partialorder %v588_v43, inf  ;;  %v621_v45 = vand.u32 2147483648, %v588_v43  ;;  %vm620_vm3 = vcmp.eq.f32.partialorder %v588_v43, 0.0 }
 0x26e   :  { %v591_v34 = vpop.xlane.xlu0 %590 }
 0x26f   :  { %945 = vrsqrt.f32 %v591_v34  ;;  %vm625_vm4 = vcmp.eq.f32.partialorder %v591_v34, inf  ;;  %v628_v48 = vand.u32 2147483648, %v591_v34  ;;  %vm627_vm5 = vcmp.eq.f32.partialorder %v591_v34, 0.0 }
 0x272   :  { %v594_v1 = vpop.xlane.xlu1 %593 }
 0x273   :  { %947 = vrsqrt.f32 %v594_v1  ;;  %vm632_vm6 = vcmp.eq.f32.partialorder %v594_v1, inf  ;;  %v635_v32 = vand.u32 2147483648, %v594_v1  ;;  %vm634_vm7 = vcmp.eq.f32.partialorder %v594_v1, 0.0 }
 0x275   :  { %v944_v47 = vpop.eup %943 }
 0x276   :  { %v617_v40 = vmul.f32 %v944_v47, %v588_v43  ;;  %v597_v41 = vpop.xlane.xlu1 %596 }
 0x277   :  { %949 = vrsqrt.f32 %v597_v41  ;;  %vm639_vm8 = vcmp.eq.f32.partialorder %v597_v41, inf  ;;  %v642_v10 = vand.u32 2147483648, %v597_v41  ;;  %vm641_vm9 = vcmp.eq.f32.partialorder %v597_v41, 0.0 }
 0x278   :  { %v619_v49 = vsel %vm618_vm2, %v588_v43, %v617_v40 }
 0x279   :  { %v946_v50 = vpop.eup %945  ;;  %v622_v46 = vsel %vm620_vm3, %v621_v45, %v619_v49 }
 0x27a   :  { %v686_v51 = vadd.f32 1e-08, %v622_v46  ;;  %v624_v53 = vmul.f32 %v946_v50, %v591_v34  ;;  %v600_v54 = vpop.xlane.xlu0 %599 }
 0x27b   :  { %951 = vrsqrt.f32 %v600_v54  ;;  %vm646_vm10 = vcmp.eq.f32.partialorder %v600_v54, inf  ;;  %v649_v39 = vand.u32 2147483648, %v600_v54  ;;  %vm648_vm11 = vcmp.eq.f32.partialorder %v600_v54, 0.0 }
 0x27c   :  { %953 = vrcp.f32 %v686_v51  ;;  %v626_v26 = vsel %vm625_vm4, %v591_v34, %v624_v53  ;;  %v603_v57 = vpop.xlane.xlu1 %602 }
 0x27d   :  { %v948_v59 = vpop.eup %947  ;;  %v629_v28 = vsel %vm627_vm5, %v628_v48, %v626_v26  ;;  %955 = vrsqrt.f32 %v603_v57  ;;  %vm653_vm12 = vcmp.eq.f32.partialorder %v603_v57, inf  ;;  %v656_v29 = vand.u32 2147483648, %v603_v57 }
 0x27e   :  { %v687_v61 = vadd.f32 1e-08, %v629_v28  ;;  %v631_v63 = vmul.f32 %v948_v59, %v594_v1  ;;  %vm655_vm13 = vcmp.eq.f32.partialorder %v603_v57, 0.0 }
 0x280   :  { %957 = vrcp.f32 %v687_v61  ;;  %v633_v2 = vsel %vm632_vm6, %v594_v1, %v631_v63 }
 0x281   :  { %v950_v3 = vpop.eup %949  ;;  %v636_v4 = vsel %vm634_vm7, %v635_v32, %v633_v2 }
 0x282   :  { %v688_v6 = vadd.f32 1e-08, %v636_v4  ;;  %v638_v7 = vmul.f32 %v950_v3, %v597_v41  ;;  %v606_v9 = vpop.xlane.xlu0 %605 }
 0x283   :  { %959 = vrsqrt.f32 %v606_v9  ;;  %vm660_vm14 = vcmp.eq.f32.partialorder %v606_v9, inf  ;;  %vm662_vm15 = vcmp.eq.f32.partialorder %v606_v9, 0.0 }
 0x284   :  { %961 = vrcp.f32 %v688_v6  ;;  %v640_v12 = vsel %vm639_vm8, %v597_v41, %v638_v7  ;;  %v609_v14 = vpop.xlane.xlu1 %608 }
 0x285   :  { %v952_v15 = vpop.eup %951  ;;  %v643_v16 = vsel %vm641_vm9, %v642_v10, %v640_v12  ;;  %963 = vrsqrt.f32 %v609_v14  ;;  %vm667_vm0 = vcmp.eq.f32.partialorder %v609_v14, inf  ;;  %v670_v26 = vand.u32 2147483648, %v609_v14 }
 0x286   :  { %v954_v36 = vpop.eup %953  ;;  %v689_v17 = vadd.f32 1e-08, %v643_v16  ;;  %v645_v18 = vmul.f32 %v952_v15, %v600_v54  ;;  %vm669_vm1 = vcmp.eq.f32.partialorder %v609_v14, 0.0 }
 0x287   :  { %v956_v37 = vpop.eup %955  ;;  %v706_v20 = vmul.f32 %v954_v36, %v1237_v52  ;;  %v707_v22 = vmul.f32 %v954_v36, %v1241_v55 }
 0x288   :  { %965 = vrcp.f32 %v689_v17  ;;  %v647_v44 = vsel %vm646_vm10, %v600_v54, %v645_v18  ;;  %v652_v24 = vmul.f32 %v956_v37, %v603_v57 }
 0x289   :  { %726 = vst [vmem:[#allocation5] sm:$0xff] %v706_v20  ;;  %727 = vst [vmem:[#allocation5 + $0x8] sm:$0xff] %v707_v22  ;;  %v650_v25 = vsel %vm648_vm11, %v649_v39, %v647_v44 }
 0x28a   :  { %v958_v30 = vpop.eup %957  ;;  %v690_v43 = vadd.f32 1e-08, %v650_v25  ;;  %v654_v34 = vsel %vm653_vm12, %v603_v57, %v652_v24  ;;  %v612_v1 = vpop.xlane.xlu0 %611 }
 0x28b   :  { %v708_v52 = vmul.f32 %v958_v30, %v1245_v56  ;;  %v709_v55 = vmul.f32 %v958_v30, %v1250_v58  ;;  %v657_v47 = vsel %vm655_vm13, %v656_v29, %v654_v34  ;;  %967 = vrsqrt.f32 %v612_v1 }
 0x28c   :  { %969 = vrcp.f32 %v690_v43  ;;  %v691_v40 = vadd.f32 1e-08, %v657_v47  ;;  %v615_v41 = vpop.xlane.xlu1 %614  ;;  %v663_v56 = vand.u32 2147483648, %v606_v9  ;;  %vm674_vm2 = vcmp.eq.f32.partialorder %v612_v1, inf }
 0x28d   :  { %v960_v45 = vpop.eup %959  ;;  %728 = vst [vmem:[#allocation5 + $0x10] sm:$0xff] %v708_v52  ;;  %729 = vst [vmem:[#allocation5 + $0x18] sm:$0xff] %v709_v55  ;;  %971 = vrsqrt.f32 %v615_v41  ;;  %vm676_vm3 = vcmp.eq.f32.partialorder %v612_v1, 0.0  ;;  %vm681_vm4 = vcmp.eq.f32.partialorder %v615_v41, inf  ;;  %v684_v16 = vand.u32 2147483648, %v615_v41 }
 0x28e   :  { %v962_v49 = vpop.eup %961  ;;  %973 = vrcp.f32 %v691_v40  ;;  %v659_v50 = vmul.f32 %v960_v45, %v606_v9  ;;  %vm683_vm5 = vcmp.eq.f32.partialorder %v615_v41, 0.0 }
 0x28f   :  { %v964_v46 = vpop.eup %963  ;;  %v710_v51 = vmul.f32 %v962_v49, %v1261_v5  ;;  %v711_v53 = vmul.f32 %v962_v49, %v1265_v8 }
 0x290   :  { %v661_v58 = vsel %vm660_vm14, %v606_v9, %v659_v50  ;;  %v666_v54 = vmul.f32 %v964_v46, %v609_v14  ;;  %v677_v9 = vand.u32 2147483648, %v612_v1 }
 0x291   :  { %730 = vst [vmem:[#allocation5 + $0x20] sm:$0xff] %v710_v51  ;;  %731 = vst [vmem:[#allocation5 + $0x28] sm:$0xff] %v711_v53  ;;  %v664_v48 = vsel %vm662_vm15, %v663_v56, %v661_v58 }
 0x292   :  { %v966_v57 = vpop.eup %965  ;;  %v692_v59 = vadd.f32 1e-08, %v664_v48  ;;  %v668_v28 = vsel %vm667_vm0, %v609_v14, %v666_v54 }
 0x293   :  { %v712_v61 = vmul.f32 %v966_v57, %v1269_v11  ;;  %v713_v5 = vmul.f32 %v966_v57, %v1274_v13  ;;  %v671_v63 = vsel %vm669_vm1, %v670_v26, %v668_v28 }
 0x294   :  { %975 = vrcp.f32 %v692_v59  ;;  %v693_v8 = vadd.f32 1e-08, %v671_v63 }
 0x295   :  { %v968_v32 = vpop.eup %967  ;;  %732 = vst [vmem:[#allocation5 + $0x30] sm:$0xff] %v712_v61  ;;  %733 = vst [vmem:[#allocation5 + $0x38] sm:$0xff] %v713_v5 }
 0x296   :  { %v970_v2 = vpop.eup %969  ;;  %977 = vrcp.f32 %v693_v8  ;;  %v673_v3 = vmul.f32 %v968_v32, %v612_v1 }
 0x297   :  { %v972_v4 = vpop.eup %971  ;;  %v714_v6 = vmul.f32 %v970_v2, %v1285_v23  ;;  %v715_v7 = vmul.f32 %v970_v2, %v1289_v27 }
 0x298   :  { %v974_v10 = vpop.eup %973  ;;  %v675_v11 = vsel %vm674_vm2, %v612_v1, %v673_v3  ;;  %v680_v13 = vmul.f32 %v972_v4, %v615_v41 }
 0x299   :  { %734 = vst [vmem:[#allocation5 + $0x40] sm:$0xff] %v714_v6  ;;  %735 = vst [vmem:[#allocation5 + $0x48] sm:$0xff] %v715_v7  ;;  %v716_v12 = vmul.f32 %v974_v10, %v1293_v33  ;;  %v717_v14 = vmul.f32 %v974_v10, %v1298_v35  ;;  %v678_v15 = vsel %vm676_vm3, %v677_v9, %v675_v11 }
 0x29a   :  { %v694_v36 = vadd.f32 1e-08, %v678_v15  ;;  %v682_v17 = vsel %vm681_vm4, %v615_v41, %v680_v13 }
 0x29b   :  { %736 = vst [vmem:[#allocation5 + $0x50] sm:$0xff] %v716_v12  ;;  %737 = vst [vmem:[#allocation5 + $0x58] sm:$0xff] %v717_v14  ;;  %v685_v23 = vsel %vm683_vm5, %v684_v16, %v682_v17 }
 0x29c   :  { %979 = vrcp.f32 %v694_v36  ;;  %v695_v27 = vadd.f32 1e-08, %v685_v23 }
 0x29e   :  { %v976_v18 = vpop.eup %975  ;;  %981 = vrcp.f32 %v695_v27 }
 0x29f   :  { %v718_v37 = vmul.f32 %v976_v18, %v1315_v60  ;;  %v719_v20 = vmul.f32 %v976_v18, %v1318_v62 }
 0x2a0   :  { %v978_v22 = vpop.eup %977 }
 0x2a1   :  { %738 = vst [vmem:[#allocation5 + $0x60] sm:$0xff] %v718_v37  ;;  %739 = vst [vmem:[#allocation5 + $0x68] sm:$0xff] %v719_v20  ;;  %v720_v33 = vmul.f32 %v978_v22, %v1321_v31  ;;  %v721_v35 = vmul.f32 %v978_v22, %v1326_v0 }
 0x2a3   :  { %740 = vst [vmem:[#allocation5 + $0x70] sm:$0xff] %v720_v33  ;;  %741 = vst [vmem:[#allocation5 + $0x78] sm:$0xff] %v721_v35 }
 0x2a6   :  { %v980_v39 = vpop.eup %979 }
 0x2a7   :  { %v722_v44 = vmul.f32 %v980_v39, %v1343_v19  ;;  %v723_v24 = vmul.f32 %v980_v39, %v1346_v21 }
 0x2a8   :  { %v982_v25 = vpop.eup %981 }
 0x2a9   :  { %742 = vst [vmem:[#allocation5 + $0x80] sm:$0xff] %v722_v44  ;;  %743 = vst [vmem:[#allocation5 + $0x88] sm:$0xff] %v723_v24  ;;  %v724_v60 = vmul.f32 %v982_v25, %v1349_v38  ;;  %v725_v62 = vmul.f32 %v982_v25, %v1354_v42 }
 0x2ab   :  { %744 = vst [vmem:[#allocation5 + $0x90] sm:$0xff] %v724_v60  ;;  %745 = vst [vmem:[#allocation5 + $0x98] sm:$0xff] %v725_v62 }
 0x2ac   :  { %1016 = shalt.err (!%p1013_p12)
}
 0x2ad   :  { %s1017_s11 = scalar_lea.hbm %s1399_s5, 2560 }
 0x2ae   :  { %p1018_p13 = scmp.ne.s32.totalorder %s1399_s5, %s1017_s11  ;;  %p1021_p0 = scmp.lt.u32.totalorder %s1017_s11, %s1399_s5 }
 0x2b0   :  { %p1023_p1 = pnand %p1021_p0, %p1018_p13 }
 0x2b2   :  { %1026 = shalt.err (!%p1023_p1)
}
 0x2b3   :  { %s1038_s16 = smov 256   ;;  %s1039_s17 = smov 16  }
 0x2b4   :  { %757 = dma.vmem_to_hbm [thread:$0]  %s752_s7, 2560, %s1399_s5, [#allocation4], %s1038_s16, %s1038_s16, %s1039_s17  }
 0x2b5   :  { %1029 = dma.done.wait [#allocation4], 2560  }
 0x2b6   :  { %1030 = vsyncadd [#allocation4], 4294964736 }
 0x2b7   :  { %761 = vsyncpa [#allocation3], 1 }
 0x2b8   :  { %762 = vsyncpa [#allocation4], 1 }

</bundles_post_ra>
